<compile_context>
chip_gen: v7x
topology: tpu7x:2x2x1
jax: 0.10.0
libtpu: 0.0.40
codegen_flags: <defaults>
</compile_context>

<pallas_src>
import jax
import jax.numpy as jnp
from jax.experimental import pallas as pl
from jax.experimental.pallas import tpu as pltpu

FPFH_DIM = 33          # module-level `fpfhDim` in the original file (standard FPFH size)
MAXDEGREE = 3
DEG1 = MAXDEGREE + 1   # maxdegree + 1
C_OUT = 64
BN_EPS = 1e-5

PACK = 2               # points packed per kernel row -> 128-wide lane-dense output
XW = PACK * FPFH_DIM   # 66
YW = PACK * DEG1       # 8
OW = PACK * C_OUT      # 128


def ft_kernel(x_ref, y_ref, w1_ref, w2_ref, b_ref, o_ref):
    # Two MXU matmuls over the split (fused-BN) channel groups + bias + ReLU.
    # bf16 inputs/weights, f32 accumulation, bf16 store.
    z = jnp.dot(x_ref[...], w1_ref[...], preferred_element_type=jnp.float32)
    z = z + jnp.dot(y_ref[...], w2_ref[...], preferred_element_type=jnp.float32)
    z = z + b_ref[...]
    o_ref[...] = jnp.maximum(z, 0.0).astype(o_ref.dtype)


def _pick_tile(rows, tile_rows, min_steps=4):
    """Largest tile <= tile_rows with >= min_steps grid steps (v7x dual-TC),
    rounded to a sublane multiple of 8."""
    per_step = -(-rows // min_steps)      # ceil(rows / min_steps)
    per_step = -(-per_step // 8) * 8      # round up to multiple of 8
    return max(8, min(tile_rows, per_step))


def feature_transform_net(x, y, packed_params, *, tile_rows=4096):
    """x: (B, N, FPFH_DIM) f32, y: (B, N, DEG1) f32  ->  (B, N, 64) bf16."""
    B, N, _ = x.shape
    M = B * N
    assert M % PACK == 0, "B*N must be even for 2-point row packing"
    # TODO(synk): odd B*N would need one padded trailing point; not required here.
    rows = M // PACK

    # bf16 I/O (dominant lever for this HBM-bound kernel); reshape is pure metadata.
    xp = x.astype(jnp.bfloat16).reshape(rows, XW)
    yp = y.astype(jnp.bfloat16).reshape(rows, YW)
    w1p, w2p, bp = packed_params

    tile = _pick_tile(rows, tile_rows)
    grid = (pl.cdiv(rows, tile),)

    out = pl.pallas_call(
        ft_kernel,
        out_shape=jax.ShapeDtypeStruct((rows, OW), jnp.bfloat16),
        grid=grid,
        in_specs=[
            pl.BlockSpec((tile, XW), lambda i: (i, 0)),   # x rows (bf16)
            pl.BlockSpec((tile, YW), lambda i: (i, 0)),   # y rows (bf16, narrow stream)
            pl.BlockSpec((XW, OW), lambda i: (0, 0)),     # block-diag fused W1 (bf16)
            pl.BlockSpec((YW, OW), lambda i: (0, 0)),     # block-diag fused W2 (bf16)
            pl.BlockSpec((1, OW), lambda i: (0, 0)),      # fused bias (f32), tiled x2
        ],
        out_specs=pl.BlockSpec((tile, OW), lambda i: (i, 0)),
        compiler_params=pltpu.CompilerParams(
            dimension_semantics=("parallel",)),
    )(xp, yp, w1p, w2p, bp)

    # (rows, 128) -> (B, N, 64): row r holds [point 2r | point 2r+1] outputs.
    return out.reshape(B, N, C_OUT)


def init_raw_params(key):
    """Conv1d(Cin, 64, k=1) + BatchNorm1d(64) parameters (inference stats)."""
    kw, kb, km = jax.random.split(key, 3)
    c_in = FPFH_DIM + DEG1
    bound = 1.0 / (c_in ** 0.5)
    w = jax.random.uniform(kw, (C_OUT, c_in), jnp.float32, -bound, bound)  # Conv1d weight (64, Cin, 1) squeezed
    b = jax.random.uniform(kb, (C_OUT,), jnp.float32, -bound, bound)       # Conv1d bias
    gamma = jnp.ones((C_OUT,), jnp.float32)                                # BN weight
    beta = jnp.zeros((C_OUT,), jnp.float32)                                # BN bias
    mean = 0.05 * jax.random.normal(km, (C_OUT,), jnp.float32)             # BN running_mean
    var = 1.1 * jnp.ones((C_OUT,), jnp.float32)                            # BN running_var
    return w, b, gamma, beta, mean, var


def fold_params(raw):
    """Fold BN into conv weights/bias, build block-diagonal packed mats (weights bf16)."""
    w, b, gamma, beta, mean, var = raw
    scale = gamma / jnp.sqrt(var + BN_EPS)            # per output channel
    wf = w * scale[:, None]                           # (64, Cin), f32 fold
    bf = (b - mean) * scale + beta                    # (64,)
    w1 = jnp.transpose(wf[:, :FPFH_DIM])              # (33, 64)
    w2 = jnp.transpose(wf[:, FPFH_DIM:])              # (4, 64)
    # Block-diagonal packing so each kernel row produces 2 points (128 lanes).
    w1p = jnp.zeros((XW, OW), jnp.float32)
    w1p = w1p.at[:FPFH_DIM, :C_OUT].set(w1).at[FPFH_DIM:, C_OUT:].set(w1)
    w2p = jnp.zeros((YW, OW), jnp.float32)
    w2p = w2p.at[:DEG1, :C_OUT].set(w2).at[DEG1:, C_OUT:].set(w2)
    bp = jnp.concatenate([bf, bf]).reshape(1, OW)     # bias stays f32 (post-MXU add)
    return w1p.astype(jnp.bfloat16), w2p.astype(jnp.bfloat16), bp


def reference(x, y, raw):
    """Unfused f32 reference matching the PyTorch forward (inference-mode BN)."""
    w, b, gamma, beta, mean, var = raw
    z = jnp.concatenate([x, y], axis=2) @ w.T + b
    z = (z - mean) * (gamma / jnp.sqrt(var + BN_EPS)) + beta
    return jnp.maximum(z, 0.0)


if __name__ == "__main__":
    key = jax.random.PRNGKey(0)
    kp, kx, ky = jax.random.split(key, 3)
    B, N = 2, 1024
    raw = init_raw_params(kp)
    packed = fold_params(raw)
    x = jax.random.normal(kx, (B, N, FPFH_DIM), jnp.float32)   # FPFH descriptors
    y = jax.random.normal(ky, (B, N, DEG1), jnp.float32)       # spherical-harmonic degree features

    out = feature_transform_net(x, y, packed)
    out = jax.block_until_ready(out)

    ref = reference(x, y, raw)
    assert out.shape == (B, N, C_OUT)
    # bf16 I/O + bf16 weights -> compare against the f32 reference with bf16-level tolerance.
    assert jnp.allclose(out.astype(jnp.float32), ref, atol=5e-2, rtol=5e-2)
    print("KERNEL_OK")
</pallas_src>

<mosaic_0001>
module attributes {stable_mosaic.version = 11 : i64} {
  func.func @ft_kernel(%arg0: i32, %arg1: memref<256x66xbf16, #tpu.memory_space<vmem>>, %arg2: memref<256x8xbf16, #tpu.memory_space<vmem>>, %arg3: memref<66x128xbf16, #tpu.memory_space<vmem>>, %arg4: memref<8x128xbf16, #tpu.memory_space<vmem>>, %arg5: memref<1x128xf32, #tpu.memory_space<vmem>>, %arg6: memref<256x128xbf16, #tpu.memory_space<vmem>>) attributes {dimension_semantics = [#tpu.dimension_semantics<parallel>], iteration_bounds = array<i64: 4>, scalar_prefetch = 0 : i64, scratch_operands = 0 : i64, tpu.core_type = #tpu.core_type<tc>, window_params = [{transform_indices = @transform_0, window_bounds = array<i64: 256, 66>}, {transform_indices = @transform_1, window_bounds = array<i64: 256, 8>}, {pipeline_mode = #tpu.pipeline_mode<synchronous>, transform_indices = @transform_2, window_bounds = array<i64: 66, 128>}, {pipeline_mode = #tpu.pipeline_mode<synchronous>, transform_indices = @transform_3, window_bounds = array<i64: 8, 128>}, {pipeline_mode = #tpu.pipeline_mode<synchronous>, transform_indices = @transform_4, window_bounds = array<i64: 1, 128>}, {transform_indices = @transform_5, window_bounds = array<i64: 256, 128>}]} {
    %c0 = arith.constant 0 : index
    %c0_0 = arith.constant 0 : index
    %0 = vector.load %arg1[%c0, %c0_0] : memref<256x66xbf16, #tpu.memory_space<vmem>>, vector<256x66xbf16>
    %c0_1 = arith.constant 0 : index
    %c0_2 = arith.constant 0 : index
    %1 = vector.load %arg3[%c0_1, %c0_2] : memref<66x128xbf16, #tpu.memory_space<vmem>>, vector<66x128xbf16>
    %cst = arith.constant dense<0.000000e+00> : vector<256x128xf32>
    %2 = tpu.matmul %0, %1, %cst {dimension_numbers = #tpu.dot_dimension_numbers<[1], [0], [0], [1], [0, 0, 1, 1], [], []>} : vector<256x66xbf16>, vector<66x128xbf16>, vector<256x128xf32> -> vector<256x128xf32>
    %c0_3 = arith.constant 0 : index
    %c0_4 = arith.constant 0 : index
    %3 = vector.load %arg2[%c0_3, %c0_4] : memref<256x8xbf16, #tpu.memory_space<vmem>>, vector<256x8xbf16>
    %c0_5 = arith.constant 0 : index
    %c0_6 = arith.constant 0 : index
    %4 = vector.load %arg4[%c0_5, %c0_6] : memref<8x128xbf16, #tpu.memory_space<vmem>>, vector<8x128xbf16>
    %cst_7 = arith.constant dense<0.000000e+00> : vector<256x128xf32>
    %5 = tpu.matmul %3, %4, %cst_7 {dimension_numbers = #tpu.dot_dimension_numbers<[1], [0], [0], [1], [0, 0, 1, 1], [], []>} : vector<256x8xbf16>, vector<8x128xbf16>, vector<256x128xf32> -> vector<256x128xf32>
    %6 = arith.addf %2, %5 : vector<256x128xf32>
    %c0_8 = arith.constant 0 : index
    %c0_9 = arith.constant 0 : index
    %7 = vector.load %arg5[%c0_8, %c0_9] : memref<1x128xf32, #tpu.memory_space<vmem>>, vector<1x128xf32>
    %8 = vector.broadcast %7 : vector<1x128xf32> to vector<256x128xf32>
    %9 = arith.addf %6, %8 : vector<256x128xf32>
    %cst_10 = arith.constant 0.000000e+00 : f32
    %10 = vector.broadcast %cst_10 : f32 to vector<256x128xf32>
    %11 = arith.maximumf %9, %10 : vector<256x128xf32>
    %12 = arith.truncf %11 : vector<256x128xf32> to vector<256x128xbf16>
    %c0_11 = arith.constant 0 : index
    %c0_12 = arith.constant 0 : index
    %13 = vector.load %arg6[%c0_11, %c0_12] : memref<256x128xbf16, #tpu.memory_space<vmem>>, vector<256x128xbf16>
    tpu.vector_store %arg6[%c0_11, %c0_12], %12 {strides = array<i32>} : memref<256x128xbf16, #tpu.memory_space<vmem>>, vector<256x128xbf16>,
    return
  }
  func.func @transform_0(%arg0: i32) -> (i32, i32) {
    %c0_i32 = arith.constant 0 : i32
    %c0_i32_0 = arith.constant 0 : i32
    return %arg0, %c0_i32 : i32, i32
  }
  func.func @transform_1(%arg0: i32) -> (i32, i32) {
    %c0_i32 = arith.constant 0 : i32
    %c0_i32_0 = arith.constant 0 : i32
    return %arg0, %c0_i32 : i32, i32
  }
  func.func @transform_2(%arg0: i32) -> (i32, i32) {
    %c0_i32 = arith.constant 0 : i32
    %c0_i32_0 = arith.constant 0 : i32
    %c0_i32_1 = arith.constant 0 : i32
    return %c0_i32, %c0_i32_0 : i32, i32
  }
  func.func @transform_3(%arg0: i32) -> (i32, i32) {
    %c0_i32 = arith.constant 0 : i32
    %c0_i32_0 = arith.constant 0 : i32
    %c0_i32_1 = arith.constant 0 : i32
    return %c0_i32, %c0_i32_0 : i32, i32
  }
  func.func @transform_4(%arg0: i32) -> (i32, i32) {
    %c0_i32 = arith.constant 0 : i32
    %c0_i32_0 = arith.constant 0 : i32
    %c0_i32_1 = arith.constant 0 : i32
    return %c0_i32, %c0_i32_0 : i32, i32
  }
  func.func @transform_5(%arg0: i32) -> (i32, i32) {
    %c0_i32 = arith.constant 0 : i32
    %c0_i32_0 = arith.constant 0 : i32
    return %arg0, %c0_i32 : i32, i32
  }
}

</mosaic_0001>

<bundles_post_ra>
// kernel: tpu_custom_call.1
= control target key start
LH: loop header
LB: loop body
LE: loop exit
PB: predicated region body
PF: predicated region fallthrough
CT: control target
= control target key end

     0   :  { %10 = vsyncpa [#allocation3], 0  ;;  %s2089_s0 = inlined_call_operand.vmem [shape: bf16[1024,66], index: 0, kind: input, shape index: {}]   ;;  %s2090_s1 = inlined_call_operand.vmem [shape: bf16[1024,8], index: 1, kind: input, shape index: {}]   ;;  %s2091_s2 = inlined_call_operand.vmem [shape: bf16[66,128], index: 2, kind: input, shape index: {}]   ;;  %s2092_s3 = inlined_call_operand.vmem [shape: bf16[8,128], index: 3, kind: input, shape index: {}]   ;;  %s2093_s4 = inlined_call_operand.vmem [shape: f32[1,128], index: 4, kind: input, shape index: {}]   ;;  %s2094_s5 = inlined_call_operand.hbm [shape: bf16[1024,128], index: 5, kind: output, shape index: {}]  }
   0x1   :  { %12 = vsyncpa [#allocation3 + $0x1], 0  ;;  %s1835_s18 = smov 0   ;;  %s1837_s19 = smov 0  }
   0x2   :  { %s1839_s20 = smov 0   ;;  %s1841_s21 = smov 0  }
   0x3 LB: > { %s1856_s22 = sadd.s32 4294967295, %s1800_s21   ;;  %s1257_s23 = sadd.s32 4294967294, %s1800_s21   ;;  %s1800_s21 = sphi %s1841_s21, %s2100_s21   ;;  %s1796_s20 = sphi %s1839_s20, %s2099_s20   ;;  %s1792_s19 = sphi %s1837_s19, %s2098_s19   ;;  %s1788_s18 = sphi %s1835_s18, %s2097_s18  }
   0x4   : > { %s1860_s24 = sadd.s32 1, %s1800_s21   ;;  %s140_s25 = sadd.s32 1, %s1796_s20 }
   0x5   : > { %s137_s26 = ssub.s32 %s1800_s21, %s1860_s24  ;;  %p150_p0 = scmp.ne.s32.totalorder %s1796_s20, %s1792_s19 }
   0x6   : > { %p138_p1 = scmp.eq.s32.totalorder %s137_s26, 0  ;;  %p151_p2 = scmp.eq.s32.totalorder %s1856_s22, 3 }
   0x7   : > { %p156_p3 = scmp.ne.s32.totalorder %s1792_s19, %s1788_s18  ;;  %p157_p4 = scmp.eq.s32.totalorder %s1257_s23, 3 }
   0x8   : > { %s1871_s27 = scalar_select %p138_p1, %s1796_s20, %s140_s25  }
   0x9   : > { %p1873_p5 = por %p151_p2, %p150_p0  ;;  %p1877_p6 = por %p157_p4, %p156_p3 }
   0xa   : > { %p1260_p7 = scmp.ge.s32.totalorder %s1800_s21, 1  ;;  %p202_p8 = scmp.lt.s32.totalorder %s1800_s21, 5 }
   0xc   : > { %p203_p9 = pnand %p1260_p7, %p202_p8 }
   0xd   : > { %v1701_v0 = vld [vmem:[%s2091_s2] sm:$0xff] (!%p203_p9)   ;;  %vm452_vm0 = vcmask (!%p203_p9), 1043456   ;;  %v1702_v3 = vld [vmem:[%s2091_s2 + $0x8] sm:$0xff] (!%p203_p9)   ;;  %s1262_s11 = sshll.u32 (!%p203_p9), %s1856_s22, 5  ;;  %v1705_v4 = vld [vmem:[%s2091_s2 + $0x10] sm:$0xff] (!%p203_p9)   ;;  %vm403_vm1 = vcmask (!%p203_p9), 64512  }
   0xe   : > { %206 = sbr.rel (%p203_p9) target bundleno = 326 (0x146), region = 40  ;;  %v322_v1 = vld [vmem:[%s2092_s3] sm:$0xf] (!%p203_p9)  ;;  %1615 = vmatprep.subr.bf16.mxu1 (!%p203_p9), %v1701_v0  ;;  %p236_p10 = scmp.lt.s32.totalorder (!%p203_p9), %s1262_s11, 127  ;;  %v1706_v5 = vld [vmem:[%s2091_s2 + $0x18] sm:$0xff] (!%p203_p9)   ;;  %vm724_vm2 = vcmask (!%p203_p9), 539648  }
   0xf   : > { %1657 = vmatprep.subr.msk.bf16.mxu0 (!%p203_p9), %vm452_vm0, %v322_v1  ;;  %v454_v2 = vsel (!%p203_p9), %vm452_vm0, %v322_v1, 0  ;;  %1620 = vmatpush3.bf16.msra.mxu1 (!%p203_p9), %v1701_v0  ;;  %v1709_v8 = vld [vmem:[%s2091_s2 + $0x20] ss:$0 sps:$4 sm:$0x11] (!%p203_p9)   ;;  %vm773_vm3 = vcmask (!%p203_p9), 1040384   ;;  %s1802_s26 = smov (!%p203_p9), [#allocation2]  }
  0x10   : > { %1540 = vmatpush3.bf16.msra.mxu0 (!%p203_p9), %v454_v2  ;;  %1616 = vmatprep.subr.bf16.mxu1 (!%p203_p9), %v1702_v3  ;;  %v775_v12 = vsel (!%p203_p9), %vm773_vm3, %v1709_v8, 0  ;;  %v1982_v44 = vld [vmem:[%s2093_s4] ss:$0 sm:$0xff] (!%p203_p9)  ;;  %s1742_s30 = sshll.u32 (!%p203_p9), %s1802_s26, 4  ;;  %s1743_s30 = int_to_ptr.vmem [resolvable:$false] %s1742_s30 }
  0x11   : > { %1573 = vmatprep.subr.bf16.mxu0 (!%p203_p9), %v1701_v0  ;;  %s1744_s6 = scalar_lea.vmem (!%p203_p9), %s1743_s30, 4096 }
  0x13   : > { %1621 = vmatpush3.bf16.msra.mxu1 (!%p203_p9), %v1702_v3 }
  0x14   : > { %1617 = vmatprep.subr.bf16.mxu1 (!%p203_p9), %v1705_v4 }
  0x15   : > { %s2102_s11 = smov (!%p236_p10, %s1262_s11), 127 }
  0x16   : > { %s1263_s14 = sshll.u32 %s2102_s11, 2  ;;  %s232_s11 = sand.u32 1, %s1792_s19  }
  0x17   : > { %s1899_s17 = scalar_lea.vmem %s2090_s1, %s1263_s14  ;;  %s1912_s8 = scalar_lea.vmem %s2089_s0, %s1263_s14  ;;  %1622 = vmatpush3.bf16.msra.mxu1 %v1705_v4 }
  0x18   : > { %v1703_v6 = vld [vmem:[%s1899_s17] sm:$0xff]   ;;  %v1704_v7 = vld [vmem:[%s1899_s17 + $0x8] sm:$0xff]   ;;  %v1707_v9 = vld [vmem:[%s1899_s17 + $0x10] sm:$0xff]   ;;  %1618 = vmatprep.subr.bf16.mxu1 %v1706_v5  ;;  %s1261_s12 = sshll.u32 %s232_s11, 7  ;;  %s1405_s14 = sshll.u32 %s1856_s22, 11 }
  0x19   : > { %1541 = vmatprep.mubr.msk.bf16.mxu0 %vm403_vm1, %v1703_v6  ;;  %v1710_v10 = vld [vmem:[%s1912_s8 + $0x10] sm:$0xff]   ;;  %v1708_v11 = vld [vmem:[%s1899_s17 + $0x18] sm:$0xff]   ;;  %v1712_v13 = vld [vmem:[%s1899_s17 + $0x20] sm:$0xff]   ;;  %s1991_s13 = scalar_lea.vmem [#allocation2], %s1261_s12  ;;  %s2040_s23 = scalar_lea.hbm %s2094_s5, %s1405_s14 }
  0x1a   : > { %1542 = vmatmul.mubr.msk.bf16.vlgmr.msra.gmra.mrb[0].mxu0 %vm403_vm1, %v1704_v7  ;;  %1587 = vmatprep.mubr.msk.bf16.mxu1 %vm724_vm2, %v1710_v10  ;;  %v1711_v14 = vld [vmem:[%s1912_s8 + $0x18] sm:$0xff]   ;;  %v1714_v15 = vld [vmem:[%s1912_s8 + $0x20] sm:$0xff]   ;;  %v1713_v16 = vld [vmem:[%s1899_s17 + $0x28] sm:$0xff]   ;;  %s1183_s15 = sshll.u32 %s1991_s13, 4  ;;  %s2048_s22 = scalar_lea.sflag [#allocation3], %s232_s11  ;;  %s2042_s15 = int_to_ptr.vmem [resolvable:$true] %s1183_s15 }
  0x1b   : > { %1574 = vmatpush3.bf16.msra.mxu0 %v1701_v0  ;;  %1545 = vmatprep.mubr.msk.bf16.mxu0 %vm403_vm1, %v1707_v9  ;;  %v1716_v17 = vld [vmem:[%s1899_s17 + $0x30] sm:$0xff]   ;;  %v1715_v18 = vld [vmem:[%s1912_s8 + $0x28] sm:$0xff]   ;;  %v1717_v20 = vld [vmem:[%s1899_s17 + $0x38] sm:$0xff]   ;;  %s1738_s25 = scalar_lea.vmem %s2042_s15, 2048  ;;  %p1745_p0 = scmp.lt.s32.totalorder %s2042_s15, %s1743_s30 }
  0x1c   : > { %1575 = vmatprep.subr.bf16.mxu0 %v1702_v3  ;;  %1623 = vmatpush3.bf16.msra.mxu1 %v1706_v5  ;;  %v1718_v19 = vld [vmem:[%s1912_s8 + $0x30] sm:$0xff]   ;;  %v1720_v21 = vld [vmem:[%s1899_s17 + $0x40] sm:$0xff]   ;;  %v1719_v22 = vld [vmem:[%s1912_s8 + $0x38] sm:$0xff]   ;;  %p1739_p11 = scmp.ne.s32.totalorder %s2042_s15, %s1738_s25  ;;  %p1746_p1 = scmp.lt.s32.totalorder %s1744_s6, %s1738_s25 }
  0x1d   : > { %1659 = vmatprep.subr.msk.bf16.mxu1 %vm773_vm3, %v1709_v8  ;;  %v1722_v23 = vld [vmem:[%s1912_s8 + $0x40] sm:$0xff]   ;;  %v1721_v24 = vld [vmem:[%s1899_s17 + $0x48] sm:$0xff]   ;;  %v1724_v25 = vld [vmem:[%s1899_s17 + $0x50] sm:$0xff]  }
  0x1e   : > { %v1723_v26 = vld [vmem:[%s1912_s8 + $0x48] sm:$0xff]   ;;  %v1726_v27 = vld [vmem:[%s1912_s8 + $0x50] sm:$0xff]   ;;  %v1725_v28 = vld [vmem:[%s1899_s17 + $0x58] sm:$0xff]   ;;  %p1740_p12 = pnand %p1739_p11, %p1873_p5  ;;  %p1747_p2 = por %p1746_p1, %p1745_p0 }
  0x1f   : > { %1576 = vmatpush3.bf16.msra.mxu0 %v1702_v3  ;;  %v1728_v29 = vld [vmem:[%s1899_s17 + $0x60] sm:$0xff]   ;;  %v1727_v30 = vld [vmem:[%s1912_s8 + $0x58] sm:$0xff]   ;;  %v1729_v32 = vld [vmem:[%s1899_s17 + $0x68] sm:$0xff]  }
  0x20   : > { %1577 = vmatprep.subr.bf16.mxu0 %v1705_v4  ;;  %1624 = vmatpush3.bf16.msra.mxu1 %v775_v12  ;;  %v1730_v31 = vld [vmem:[%s1912_s8 + $0x60] sm:$0xff]   ;;  %v1732_v33 = vld [vmem:[%s1899_s17 + $0x70] sm:$0xff]   ;;  %v1731_v34 = vld [vmem:[%s1912_s8 + $0x68] sm:$0xff]   ;;  %p1741_p13 = pneg %p1740_p12 }
  0x21   : > { %v1734_v35 = vld [vmem:[%s1912_s8 + $0x70] sm:$0xff]   ;;  %v1733_v36 = vld [vmem:[%s1899_s17 + $0x78] sm:$0xff]   ;;  %v1736_v37 = vld [vmem:[%s1912_s8] sm:$0xff]  }
  0x22   : > { %1546 = vmatmul.mubr.msk.bf16.gmra.mrb[4].mxu0 %vm403_vm1, %v1708_v11  ;;  %v1735_v38 = vld [vmem:[%s1912_s8 + $0x78] sm:$0xff]   ;;  %v1737_v39 = vld [vmem:[%s1912_s8 + $0x8] sm:$0xff]   ;;  %p1748_p3 = pnand %p1747_p2, %p1741_p13 }
  0x23   : > { %1549 = vmatprep.mubr.msk.bf16.mxu0 %vm403_vm1, %v1712_v13  ;;  %1578 = vmatpush3.bf16.msra.mxu0 %v1705_v4 }
  0x24   : > { %1588 = vmatmul.mubr.msk.bf16.vlgmr.msra.gmra.mrb[0].mxu1 %vm724_vm2, %v1711_v14  ;;  %1579 = vmatprep.subr.bf16.mxu0 %v1706_v5 }
  0x25   : > { %1591 = vmatprep.mubr.msk.bf16.mxu1 %vm724_vm2, %v1714_v15 }
  0x27   : > { %1580 = vmatpush3.bf16.msra.mxu0 %v1706_v5 }
  0x28   : > { %1658 = vmatprep.subr.msk.bf16.mxu0 %vm773_vm3, %v1709_v8 }
  0x2a   : > { %1550 = vmatmul.mubr.msk.bf16.gmra.mrb[8].mxu0 %vm403_vm1, %v1713_v16 }
  0x2b   : > { %1553 = vmatprep.mubr.msk.bf16.mxu0 %vm403_vm1, %v1716_v17  ;;  %1582 = vmatpush3.bf16.msra.mxu0 %v775_v12 }
  0x2c   : > { %1592 = vmatmul.mubr.msk.bf16.gmra.mrb[4].mxu1 %vm724_vm2, %v1715_v18 }
  0x2d   : > { %1595 = vmatprep.mubr.msk.bf16.mxu1 %vm724_vm2, %v1718_v19 }
  0x32   : > { %1554 = vmatmul.mubr.msk.bf16.gmra.mrb[12].mxu0 %vm403_vm1, %v1717_v20 }
  0x33   : > { %1557 = vmatprep.mubr.msk.bf16.mxu0 %vm403_vm1, %v1720_v21 }
  0x34   : > { %1596 = vmatmul.mubr.msk.bf16.gmra.mrb[8].mxu1 %vm724_vm2, %v1719_v22 }
  0x35   : > { %1599 = vmatprep.mubr.msk.bf16.mxu1 %vm724_vm2, %v1722_v23 }
  0x3a   : > { %1558 = vmatmul.mubr.msk.bf16.gmra.mrb[16].mxu0 %vm403_vm1, %v1721_v24 }
  0x3b   : > { %1561 = vmatprep.mubr.msk.bf16.mxu0 %vm403_vm1, %v1724_v25 }
  0x3c   : > { %1600 = vmatmul.mubr.msk.bf16.gmra.mrb[12].mxu1 %vm724_vm2, %v1723_v26 }
  0x3d   : > { %1603 = vmatprep.mubr.msk.bf16.mxu1 %vm724_vm2, %v1726_v27 }
  0x42   : > { %1562 = vmatmul.mubr.msk.bf16.gmra.mrb[20].mxu0 %vm403_vm1, %v1725_v28 }
  0x43   : > { %1565 = vmatprep.mubr.msk.bf16.mxu0 %vm403_vm1, %v1728_v29 }
  0x44   : > { %1604 = vmatmul.mubr.msk.bf16.gmra.mrb[16].mxu1 %vm724_vm2, %v1727_v30 }
  0x45   : > { %1607 = vmatprep.mubr.msk.bf16.mxu1 %vm724_vm2, %v1730_v31 }
  0x4a   : > { %1566 = vmatmul.mubr.msk.bf16.gmra.mrb[24].mxu0 %vm403_vm1, %v1729_v32 }
  0x4b   : > { %1569 = vmatprep.mubr.msk.bf16.mxu0 %vm403_vm1, %v1732_v33 }
  0x4c   : > { %1608 = vmatmul.mubr.msk.bf16.gmra.mrb[20].mxu1 %vm724_vm2, %v1731_v34 }
  0x4d   : > { %1611 = vmatprep.mubr.msk.bf16.mxu1 %vm724_vm2, %v1734_v35 }
  0x52   : > { %1570 = vmatmul.mubr.msk.bf16.gmra.mrb[28].mxu0 %vm403_vm1, %v1733_v36 }
  0x53   : > { %1583 = vmatprep.mubr.msk.bf16.mxu0 %vm724_vm2, %v1736_v37 }
  0x54   : > { %1612 = vmatmul.mubr.msk.bf16.gmra.mrb[24].mxu1 %vm724_vm2, %v1735_v38 }
  0x5a   : > { %1584 = vmatmul.mubr.msk.bf16.vlgmr.msra.gmra.mrb[0].mxu0 %vm724_vm2, %v1737_v39 }
  0xf5   : > { %v1547_v40 = vpop.f32.mrb[4].mxu0 }
  0xf6   : > { %v506_v41 = vpop.f32.mrb[5].mxu0 }
  0xf7   : > { %v1548_v42 = vpop.f32.mrb[6].mxu0  ;;  %v1589_v43 = vpop.f32.mrb[0].mxu1 }
  0xf8   : > { %v509_v45 = vpop.f32.mrb[7].mxu0  ;;  %v836_v46 = vadd.f32 %v1589_v43, %v1547_v40  ;;  %v827_v47 = vpop.f32.mrb[1].mxu1 }
  0xf9   : > { %v828_v48 = vadd.f32 %v827_v47, %v506_v41  ;;  %v1590_v49 = vpop.f32.mrb[2].mxu1 }
  0xfa   : > { %v951_v50 = vadd.f32 %v1982_v44, %v836_v46  ;;  %v839_v51 = vadd.f32 %v1590_v49, %v1548_v42  ;;  %v830_v52 = vpop.f32.mrb[3].mxu1 }
  0xfb   : > { %v949_v53 = vadd.f32 %v1982_v44, %v828_v48  ;;  %v831_v54 = vadd.f32 %v830_v52, %v509_v45 }
  0xfc   : > { %v952_v55 = vadd.f32 %v1982_v44, %v839_v51  ;;  %v983_v58 = vmax.f32 %v951_v50, 0.0 }
  0xfd   : > { %v950_v56 = vadd.f32 %v1982_v44, %v831_v54  ;;  %v1551_v57 = vpop.f32.mrb[8].mxu0  ;;  %v981_v61 = vmax.f32 %v949_v53, 0.0 }
  0xfe   : > { %v984_v59 = vmax.f32 %v952_v55, 0.0  ;;  %v522_v60 = vpop.f32.mrb[9].mxu0 }
  0xff   : > { %v982_v62 = vmax.f32 %v950_v56, 0.0  ;;  %v1552_v63 = vpop.f32.mrb[10].mxu0  ;;  %v1593_v0 = vpop.f32.mrb[4].mxu1 }
 0x100   : > { %v1424_v1 = vpack.c.bf16 %v984_v59, %v983_v58  ;;  %v525_v2 = vpop.f32.mrb[11].mxu0  ;;  %v852_v3 = vadd.f32 %v1593_v0, %v1551_v57  ;;  %v843_v4 = vpop.f32.mrb[5].mxu1 }
 0x101   : > { %v1419_v5 = vpack.c.bf16 %v982_v62, %v981_v61  ;;  %v844_v6 = vadd.f32 %v843_v4, %v522_v60  ;;  %v1594_v7 = vpop.f32.mrb[6].mxu1 }
 0x102   : > { %1488 = vst [vmem:[%s1991_s13 + $0x18] sm:$0xff] %v1424_v1   ;;  %v955_v8 = vadd.f32 %v1982_v44, %v852_v3  ;;  %v855_v9 = vadd.f32 %v1594_v7, %v1552_v63  ;;  %v846_v10 = vpop.f32.mrb[7].mxu1 }
 0x103   : > { %1487 = vst [vmem:[%s1991_s13 + $0x10] sm:$0xff] %v1419_v5   ;;  %v953_v11 = vadd.f32 %v1982_v44, %v844_v6  ;;  %v847_v12 = vadd.f32 %v846_v10, %v525_v2 }
 0x104   : > { %v956_v13 = vadd.f32 %v1982_v44, %v855_v9  ;;  %v987_v16 = vmax.f32 %v955_v8, 0.0 }
 0x105   : > { %v954_v14 = vadd.f32 %v1982_v44, %v847_v12  ;;  %v1555_v15 = vpop.f32.mrb[12].mxu0  ;;  %v985_v19 = vmax.f32 %v953_v11, 0.0 }
 0x106   : > { %v988_v17 = vmax.f32 %v956_v13, 0.0  ;;  %v538_v18 = vpop.f32.mrb[13].mxu0 }
 0x107   : > { %v986_v20 = vmax.f32 %v954_v14, 0.0  ;;  %v1556_v21 = vpop.f32.mrb[14].mxu0  ;;  %v1597_v22 = vpop.f32.mrb[8].mxu1 }
 0x108   : > { %v1434_v23 = vpack.c.bf16 %v988_v17, %v987_v16  ;;  %v541_v24 = vpop.f32.mrb[15].mxu0  ;;  %v868_v25 = vadd.f32 %v1597_v22, %v1555_v15  ;;  %v859_v26 = vpop.f32.mrb[9].mxu1 }
 0x109   : > { %v1429_v27 = vpack.c.bf16 %v986_v20, %v985_v19  ;;  %v860_v28 = vadd.f32 %v859_v26, %v538_v18  ;;  %v1598_v29 = vpop.f32.mrb[10].mxu1 }
 0x10a   : > { %1490 = vst [vmem:[%s1991_s13 + $0x28] sm:$0xff] %v1434_v23   ;;  %v959_v30 = vadd.f32 %v1982_v44, %v868_v25  ;;  %v871_v31 = vadd.f32 %v1598_v29, %v1556_v21  ;;  %v862_v32 = vpop.f32.mrb[11].mxu1 }
 0x10b   : > { %1489 = vst [vmem:[%s1991_s13 + $0x20] sm:$0xff] %v1429_v27   ;;  %v957_v33 = vadd.f32 %v1982_v44, %v860_v28  ;;  %v863_v34 = vadd.f32 %v862_v32, %v541_v24 }
 0x10c   : > { %v960_v35 = vadd.f32 %v1982_v44, %v871_v31  ;;  %v991_v38 = vmax.f32 %v959_v30, 0.0 }
 0x10d   : > { %v958_v36 = vadd.f32 %v1982_v44, %v863_v34  ;;  %v1559_v37 = vpop.f32.mrb[16].mxu0  ;;  %v989_v41 = vmax.f32 %v957_v33, 0.0 }
 0x10e   : > { %v992_v39 = vmax.f32 %v960_v35, 0.0  ;;  %v554_v40 = vpop.f32.mrb[17].mxu0 }
 0x10f   : > { %v990_v42 = vmax.f32 %v958_v36, 0.0  ;;  %v1560_v43 = vpop.f32.mrb[18].mxu0  ;;  %v1601_v45 = vpop.f32.mrb[12].mxu1 }
 0x110   : > { %v1444_v46 = vpack.c.bf16 %v992_v39, %v991_v38  ;;  %v557_v47 = vpop.f32.mrb[19].mxu0  ;;  %v884_v48 = vadd.f32 %v1601_v45, %v1559_v37  ;;  %v875_v49 = vpop.f32.mrb[13].mxu1 }
 0x111   : > { %v1439_v50 = vpack.c.bf16 %v990_v42, %v989_v41  ;;  %v876_v51 = vadd.f32 %v875_v49, %v554_v40  ;;  %v1602_v52 = vpop.f32.mrb[14].mxu1 }
 0x112   : > { %1492 = vst [vmem:[%s1991_s13 + $0x38] sm:$0xff] %v1444_v46   ;;  %v963_v53 = vadd.f32 %v1982_v44, %v884_v48  ;;  %v887_v54 = vadd.f32 %v1602_v52, %v1560_v43  ;;  %v878_v55 = vpop.f32.mrb[15].mxu1 }
 0x113   : > { %1491 = vst [vmem:[%s1991_s13 + $0x30] sm:$0xff] %v1439_v50   ;;  %v961_v56 = vadd.f32 %v1982_v44, %v876_v51  ;;  %v879_v57 = vadd.f32 %v878_v55, %v557_v47 }
 0x114   : > { %v964_v58 = vadd.f32 %v1982_v44, %v887_v54  ;;  %v995_v61 = vmax.f32 %v963_v53, 0.0 }
 0x115   : > { %v962_v59 = vadd.f32 %v1982_v44, %v879_v57  ;;  %v1563_v60 = vpop.f32.mrb[20].mxu0  ;;  %v993_v0 = vmax.f32 %v961_v56, 0.0 }
 0x116   : > { %v996_v62 = vmax.f32 %v964_v58, 0.0  ;;  %v570_v63 = vpop.f32.mrb[21].mxu0 }
 0x117   : > { %v994_v1 = vmax.f32 %v962_v59, 0.0  ;;  %v1564_v2 = vpop.f32.mrb[22].mxu0  ;;  %v1605_v3 = vpop.f32.mrb[16].mxu1 }
 0x118   : > { %v1454_v4 = vpack.c.bf16 %v996_v62, %v995_v61  ;;  %v573_v5 = vpop.f32.mrb[23].mxu0  ;;  %v900_v6 = vadd.f32 %v1605_v3, %v1563_v60  ;;  %v891_v7 = vpop.f32.mrb[17].mxu1 }
 0x119   : > { %v1449_v8 = vpack.c.bf16 %v994_v1, %v993_v0  ;;  %v892_v9 = vadd.f32 %v891_v7, %v570_v63  ;;  %v1606_v10 = vpop.f32.mrb[18].mxu1 }
 0x11a   : > { %1494 = vst [vmem:[%s1991_s13 + $0x48] sm:$0xff] %v1454_v4   ;;  %v967_v11 = vadd.f32 %v1982_v44, %v900_v6  ;;  %v903_v12 = vadd.f32 %v1606_v10, %v1564_v2  ;;  %v894_v13 = vpop.f32.mrb[19].mxu1 }
 0x11b   : > { %1493 = vst [vmem:[%s1991_s13 + $0x40] sm:$0xff] %v1449_v8   ;;  %v965_v14 = vadd.f32 %v1982_v44, %v892_v9  ;;  %v895_v15 = vadd.f32 %v894_v13, %v573_v5 }
 0x11c   : > { %v968_v16 = vadd.f32 %v1982_v44, %v903_v12  ;;  %v999_v19 = vmax.f32 %v967_v11, 0.0 }
 0x11d   : > { %v966_v17 = vadd.f32 %v1982_v44, %v895_v15  ;;  %v1567_v18 = vpop.f32.mrb[24].mxu0  ;;  %v997_v22 = vmax.f32 %v965_v14, 0.0 }
 0x11e   : > { %v1000_v20 = vmax.f32 %v968_v16, 0.0  ;;  %v586_v21 = vpop.f32.mrb[25].mxu0 }
 0x11f   : > { %v998_v23 = vmax.f32 %v966_v17, 0.0  ;;  %v1568_v24 = vpop.f32.mrb[26].mxu0  ;;  %v1609_v25 = vpop.f32.mrb[20].mxu1 }
 0x120   : > { %v1464_v26 = vpack.c.bf16 %v1000_v20, %v999_v19  ;;  %v589_v27 = vpop.f32.mrb[27].mxu0  ;;  %v916_v28 = vadd.f32 %v1609_v25, %v1567_v18  ;;  %v907_v29 = vpop.f32.mrb[21].mxu1 }
 0x121   : > { %v1459_v30 = vpack.c.bf16 %v998_v23, %v997_v22  ;;  %v908_v31 = vadd.f32 %v907_v29, %v586_v21  ;;  %v1610_v32 = vpop.f32.mrb[22].mxu1 }
 0x122   : > { %1496 = vst [vmem:[%s1991_s13 + $0x58] sm:$0xff] %v1464_v26   ;;  %v971_v33 = vadd.f32 %v1982_v44, %v916_v28  ;;  %v919_v34 = vadd.f32 %v1610_v32, %v1568_v24  ;;  %v910_v35 = vpop.f32.mrb[23].mxu1 }
 0x123   : > { %1495 = vst [vmem:[%s1991_s13 + $0x50] sm:$0xff] %v1459_v30   ;;  %v969_v36 = vadd.f32 %v1982_v44, %v908_v31  ;;  %v911_v37 = vadd.f32 %v910_v35, %v589_v27 }
 0x124   : > { %v972_v38 = vadd.f32 %v1982_v44, %v919_v34  ;;  %v1003_v41 = vmax.f32 %v971_v33, 0.0 }
 0x125   : > { %v970_v39 = vadd.f32 %v1982_v44, %v911_v37  ;;  %v1571_v40 = vpop.f32.mrb[28].mxu0  ;;  %v1001_v45 = vmax.f32 %v969_v36, 0.0 }
 0x126   : > { %v1004_v42 = vmax.f32 %v972_v38, 0.0  ;;  %v602_v43 = vpop.f32.mrb[29].mxu0 }
 0x127   : > { %v1002_v46 = vmax.f32 %v970_v39, 0.0  ;;  %v1572_v47 = vpop.f32.mrb[30].mxu0  ;;  %v1613_v48 = vpop.f32.mrb[24].mxu1 }
 0x128   : > { %v1474_v49 = vpack.c.bf16 %v1004_v42, %v1003_v41  ;;  %v605_v50 = vpop.f32.mrb[31].mxu0  ;;  %v932_v51 = vadd.f32 %v1613_v48, %v1571_v40  ;;  %v923_v52 = vpop.f32.mrb[25].mxu1 }
 0x129   : > { %v1469_v53 = vpack.c.bf16 %v1002_v46, %v1001_v45  ;;  %v924_v54 = vadd.f32 %v923_v52, %v602_v43  ;;  %v1614_v55 = vpop.f32.mrb[26].mxu1 }
 0x12a   : > { %1498 = vst [vmem:[%s1991_s13 + $0x68] sm:$0xff] %v1474_v49   ;;  %v975_v56 = vadd.f32 %v1982_v44, %v932_v51  ;;  %v935_v57 = vadd.f32 %v1614_v55, %v1572_v47  ;;  %v926_v58 = vpop.f32.mrb[27].mxu1 }
 0x12b   : > { %1497 = vst [vmem:[%s1991_s13 + $0x60] sm:$0xff] %v1469_v53   ;;  %v973_v59 = vadd.f32 %v1982_v44, %v924_v54  ;;  %v927_v60 = vadd.f32 %v926_v58, %v605_v50 }
 0x12c   : > { %v976_v61 = vadd.f32 %v1982_v44, %v935_v57  ;;  %v1007_v0 = vmax.f32 %v975_v56, 0.0 }
 0x12d   : > { %v974_v62 = vadd.f32 %v1982_v44, %v927_v60  ;;  %v1585_v63 = vpop.f32.mrb[0].mxu0  ;;  %v1005_v4 = vmax.f32 %v973_v59, 0.0 }
 0x12e   : > { %v1008_v1 = vmax.f32 %v976_v61, 0.0  ;;  %v947_v2 = vadd.f32 %v1585_v63, %v1982_v44  ;;  %v811_v3 = vpop.f32.mrb[1].mxu0 }
 0x12f   : > { %v1006_v5 = vmax.f32 %v974_v62, 0.0  ;;  %v945_v6 = vadd.f32 %v1982_v44, %v811_v3  ;;  %v1586_v7 = vpop.f32.mrb[2].mxu0 }
 0x130   : > { %v1484_v8 = vpack.c.bf16 %v1008_v1, %v1007_v0  ;;  %v948_v9 = vadd.f32 %v1586_v7, %v1982_v44  ;;  %v814_v10 = vpop.f32.mrb[3].mxu0  ;;  %v979_v13 = vmax.f32 %v947_v2, 0.0 }
 0x131   : > { %v1479_v11 = vpack.c.bf16 %v1006_v5, %v1005_v4  ;;  %v946_v12 = vadd.f32 %v1982_v44, %v814_v10  ;;  %v977_v15 = vmax.f32 %v945_v6, 0.0 }
 0x132   : > { %1500 = vst [vmem:[%s1991_s13 + $0x78] sm:$0xff] %v1484_v8   ;;  %v980_v14 = vmax.f32 %v948_v9, 0.0 }
 0x133   : > { %1499 = vst [vmem:[%s1991_s13 + $0x70] sm:$0xff] %v1479_v11   ;;  %v978_v16 = vmax.f32 %v946_v12, 0.0 }
 0x134   : > { %v1414_v17 = vpack.c.bf16 %v980_v14, %v979_v13 }
 0x135   : > { %v1409_v44 = vpack.c.bf16 %v978_v16, %v977_v15 }
 0x136   : > { %1486 = vst [vmem:[%s1991_s13 + $0x8] sm:$0xff] %v1414_v17  }
 0x137   : > { %1410 = vst [vmem:[%s1991_s13] sm:$0xff] %v1409_v44  }
 0x138   : > { %1751 = shalt.err (!%p1748_p3)
}
 0x139   : > { %s1752_s7 = scalar_lea.hbm %s2040_s23, 2048  ;;  %s1756_s10 = scalar_lea.hbm %s2094_s5, 8192 }
 0x13a   : > { %p1753_p4 = scmp.ne.s32.totalorder %s2040_s23, %s1752_s7  ;;  %p1757_p9 = scmp.lt.u32.totalorder %s2040_s23, %s2094_s5 }
 0x13b   : > { %p1758_p10 = scmp.lt.u32.totalorder %s1756_s10, %s1752_s7  ;;  %p1760_p12 = scmp.lt.u32.totalorder %s1752_s7, %s2040_s23 }
 0x13c   : > { %p1754_p7 = pnand %p1753_p4, %p1873_p5 }
 0x13d   : > { %p1759_p11 = por %p1758_p10, %p1757_p9 }
 0x13e   : > { %p1755_p8 = pneg %p1754_p7 }
 0x13f   : > { %p1761_p13 = por %p1760_p12, %p1759_p11 }
 0x141   : > { %p1762_p0 = pnand %p1761_p13, %p1755_p8 }
 0x143   : > { %1765 = shalt.err (!%p1762_p0)
}
 0x144   : > { %s1803_s13 = smov 64   ;;  %s1804_s14 = smov 4  }
 0x145   : > { %1660 = dma.vmem_to_hbm [thread:$0]  (%p1873_p5), %s2042_s15, 2048, %s2040_s23, %s2048_s22, %s1803_s13, %s1803_s13, %s1804_s14  }
 0x146 PF: > { %p1666_p1 = scmp.ge.s32.totalorder %s1800_s21, 2  ;;  %s1198_s16 = sand.u32 1, %s1788_s18  }
 0x147   : > { %s1199_s17 = scalar_lea.sflag [#allocation3], %s1198_s16 }
 0x148   : > { %p1663_p2 = pnand %p1666_p1, %p1877_p6 }
 0x14a   : > { %1783 = dma.done.wait (!%p1663_p2), %s1199_s17, 2048  }
 0x14b   : > { %1785 = vsyncadd (!%p1663_p2), %s1199_s17, 4294965248  ;;  %p15_p3 = scmp.ge.s32.totalorder %s1860_s24, 6   ;;  %s2097_s18 = smov %s1792_s19 }
 0x14c   : > { %s2098_s19 = smov %s1796_s20  ;;  %s2099_s20 = smov %s1871_s27 }
 0x14d   : > { %s2100_s21 = smov %s1860_s24  ;;  %17 = sbr.rel (!%p15_p3) target bundleno = 3 (0x3), region = 78 }
 0x154   :  { %1204 = vsyncpa [#allocation3], 1 }
 0x155   :  { %1206 = vsyncpa [#allocation3 + $0x1], 1 }

</bundles_post_ra>
